<compile_context>
chip_gen: v7x
topology: tpu7x:2x2x1
jax: 0.10.0
libtpu: 0.0.40
codegen_flags: <defaults>
</compile_context>

<pallas_src>
import functools

import jax
import jax.numpy as jnp
from jax.experimental import pallas as pl
from jax.experimental.pallas import tpu as pltpu

_LANE = 128


def _round_up(x, m):
    return (x + m - 1) // m * m


def _cdiv(a, b):
    return (a + b - 1) // b


def _budgets():
    """(per-input-block VMEM budget, vmem_limit_bytes), generation-aware."""
    vmem_cap = 64 * 1024 * 1024            # conservative default: v7x per-TC
    try:
        cap = getattr(pltpu.get_tpu_info(), "vmem_capacity_bytes", None)
        if cap:
            vmem_cap = int(cap)
    except Exception:
        pass
    if vmem_cap >= 128 * 1024 * 1024:      # v5e / v6e
        return 8 * 1024 * 1024, 48 * 1024 * 1024
    return 4 * 1024 * 1024, 24 * 1024 * 1024


def _plan(num_rows, hw, itemsize, budget):
    """Pick (row_block, hw_block). hw_block == hw means single-pass kernel."""
    # VMEM rows are lane-padded to 128, so budget against the padded row size.
    row_bytes = _round_up(hw, _LANE) * itemsize
    fits_rows = budget // row_bytes
    if fits_rows >= num_rows:
        # Whole problem fits one block; still split rows in two multiple-of-128
        # blocks when possible so both v7x TensorCores get work.
        if num_rows >= 2 * _LANE:
            return _round_up(_cdiv(num_rows, 2), _LANE), hw
        return num_rows, hw
    if fits_rows >= _LANE:
        # Full rows, many rows per block (multiple of 128 for the lane-dense
        # output block).
        return (fits_rows // _LANE) * _LANE, hw
    # Very large H*W: tile the reduction axis instead.
    row_block = num_rows if num_rows <= _LANE else _LANE
    hw_block = (budget // (row_block * itemsize)) // _LANE * _LANE
    hw_block = max(_LANE, min(hw_block, 128 * _LANE))   # cap in-kernel unroll
    return row_block, hw_block


def _pool_rows_kernel(x_ref, o_ref, *, inv_hw):
    """Single-pass fused max+mean over whole rows.

    x_ref: (row_block, hw)   rows on sublanes, H*W on lanes
    o_ref: (2, row_block)    lane-dense; row 0 = max, row 1 = mean
    """
    x = x_ref[...].astype(jnp.float32)
    mx = jnp.max(x, axis=1, keepdims=True)                 # (rows, 1)
    av = jnp.sum(x, axis=1, keepdims=True) * inv_hw        # (rows, 1)
    o_ref[...] = jnp.concatenate(
        [jnp.transpose(mx, (1, 0)), jnp.transpose(av, (1, 0))],
        axis=0).astype(o_ref.dtype)


def _pool_rows_tiled_kernel(x_ref, o_ref, mx_ref, sm_ref, *,
                            inv_hw, n_slices, rem):
    """Tiled reduction over H*W with lane-dense f32 accumulators.

    x_ref:  (row_block, hw_block) input block for reduction step j
    o_ref:  (2, row_block) output block (constant block index across j)
    mx_ref, sm_ref: (row_block, 128) f32 scratch, resident across j
    rem:    number of valid lanes in the last (ragged) hw block, 0 if exact.
    """
    j = pl.program_id(1)
    last = pl.num_programs(1) - 1

    @pl.when(j == 0)
    def _():
        mx_ref[...] = jnp.full(mx_ref.shape, -jnp.inf, jnp.float32)
        sm_ref[...] = jnp.zeros(sm_ref.shape, jnp.float32)

    def fold(valid_lanes):
        # VPU-only accumulation onto full 128-lane vregs; the single cross-lane
        # XLU reduce happens once, in the finalize step below.
        acc_mx, acc_sm = mx_ref[...], sm_ref[...]
        for t in range(n_slices):
            lo = t * _LANE
            if lo >= valid_lanes:                      # statically past the end
                break
            sl = x_ref[:, lo:lo + _LANE].astype(jnp.float32)
            if lo + _LANE > valid_lanes:               # ragged final 128-slice
                lane = jax.lax.broadcasted_iota(jnp.int32, sl.shape, 1)
                keep = lane < (valid_lanes - lo)
                acc_mx = jnp.maximum(acc_mx, jnp.where(keep, sl, -jnp.inf))
                acc_sm = acc_sm + jnp.where(keep, sl, 0.0)
            else:
                acc_mx = jnp.maximum(acc_mx, sl)
                acc_sm = acc_sm + sl
        mx_ref[...] = acc_mx
        sm_ref[...] = acc_sm

    if rem == 0:
        fold(n_slices * _LANE)                         # no masking ever needed
    else:
        @pl.when(j != last)
        def _():
            fold(n_slices * _LANE)

        @pl.when(j == last)
        def _():
            fold(rem)                                  # mask only the tail block

    @pl.when(j == last)
    def _():
        mx = jnp.max(mx_ref[...], axis=1, keepdims=True)           # (rows, 1)
        av = jnp.sum(sm_ref[...], axis=1, keepdims=True) * inv_hw  # (rows, 1)
        o_ref[...] = jnp.concatenate(
            [jnp.transpose(mx, (1, 0)), jnp.transpose(av, (1, 0))],
            axis=0).astype(o_ref.dtype)


def _adaptive_concat_pool2d(x, block_budget_bytes=None):
    """torch.cat([AdaptiveMaxPool2d(1)(x), AdaptiveAvgPool2d(1)(x)], 1)."""
    N, C, H, W = x.shape
    rows, hw = N * C, H * W
    itemsize = jnp.dtype(x.dtype).itemsize
    if block_budget_bytes is None:
        budget, vmem_limit = _budgets()
    else:                                   # test hook: force the tiled path
        budget, vmem_limit = int(block_budget_bytes), 24 * 1024 * 1024

    row_block, hw_block = _plan(rows, hw, itemsize, budget)
    inv_hw = 1.0 / hw
    n_r = _cdiv(rows, row_block)
    x2 = x.reshape(rows, hw)                # contiguous NCHW view; free

    if hw_block == hw:
        pooled = pl.pallas_call(
            functools.partial(_pool_rows_kernel, inv_hw=inv_hw),
            out_shape=jax.ShapeDtypeStruct((2, rows), x.dtype),
            grid_spec=pltpu.PrefetchScalarGridSpec(
                num_scalar_prefetch=0,
                grid=(n_r,),
                in_specs=[pl.BlockSpec((row_block, hw), lambda r: (r, 0))],
                out_specs=pl.BlockSpec((2, row_block), lambda r: (0, r))),
            compiler_params=pltpu.CompilerParams(
                dimension_semantics=("parallel",),
                vmem_limit_bytes=vmem_limit),
        )(x2)
    else:
        n_hw = _cdiv(hw, hw_block)
        pooled = pl.pallas_call(
            functools.partial(_pool_rows_tiled_kernel, inv_hw=inv_hw,
                              n_slices=hw_block // _LANE, rem=hw % hw_block),
            out_shape=jax.ShapeDtypeStruct((2, rows), x.dtype),
            grid_spec=pltpu.PrefetchScalarGridSpec(
                num_scalar_prefetch=0,
                grid=(n_r, n_hw),
                in_specs=[pl.BlockSpec((row_block, hw_block),
                                       lambda r, j: (r, j))],
                out_specs=pl.BlockSpec((2, row_block), lambda r, j: (0, r)),
                scratch_shapes=[pltpu.VMEM((row_block, _LANE), jnp.float32),
                                pltpu.VMEM((row_block, _LANE), jnp.float32)]),
            compiler_params=pltpu.CompilerParams(
                dimension_semantics=("parallel", "arbitrary"),
                vmem_limit_bytes=vmem_limit),
        )(x2)

    # pooled is (2, N*C): row 0 = max, row 1 = mean. Reorder to torch.cat order
    # (N, 2, C) -> (N, 2C, 1, 1); only 2*N*C elements, negligible vs. x.
    out = jnp.transpose(pooled.reshape(2, N, C), (1, 0, 2))
    return out.reshape(N, 2 * C, 1, 1)


adaptive_concat_pool2d = jax.jit(_adaptive_concat_pool2d,
                                 static_argnames=("block_budget_bytes",))


def _reference(x):
    return jnp.concatenate([jnp.max(x, axis=(2, 3), keepdims=True),
                            jnp.mean(x, axis=(2, 3), keepdims=True)], axis=1)


if __name__ == "__main__":
    key = jax.random.PRNGKey(0)
    k1, k2 = jax.random.split(key)

    # 1) Default path (single-pass kernel): N=2, C=4, H=W=16.
    x = jax.random.normal(k1, (2, 4, 16, 16), jnp.float32)
    out = jax.block_until_ready(adaptive_concat_pool2d(x))
    assert out.shape == (2, 8, 1, 1), out.shape
    ref = _reference(x)
    assert jnp.allclose(out, ref, atol=1e-5, rtol=1e-5), float(
        jnp.max(jnp.abs(out - ref)))

    # 2) Tiled-reduction path with a ragged H*W tail (forced via a tiny block
    #    budget so it runs on every TPU generation): N=2, C=4, H=W=60.
    x2 = jax.random.normal(k2, (2, 4, 60, 60), jnp.float32)
    out2 = jax.block_until_ready(
        adaptive_concat_pool2d(x2, block_budget_bytes=64 * 1024))
    ref2 = _reference(x2)
    assert out2.shape == (2, 8, 1, 1), out2.shape
    assert jnp.allclose(out2, ref2, atol=1e-5, rtol=1e-5), float(
        jnp.max(jnp.abs(out2 - ref2)))

    print("KERNEL_OK")
</pallas_src>

<mosaic_0001>
module attributes {stable_mosaic.version = 11 : i64} {
  func.func @_pool_rows_kernel(%arg0: i32, %arg1: memref<8x256xf32, #tpu.memory_space<vmem>>, %arg2: memref<2x8xf32, #tpu.memory_space<vmem>>) attributes {dimension_semantics = [#tpu.dimension_semantics<parallel>], iteration_bounds = array<i64: 1>, scalar_prefetch = 0 : i64, scratch_operands = 0 : i64, tpu.core_type = #tpu.core_type<tc>, window_params = [{transform_indices = @transform_0, window_bounds = array<i64: 8, 256>}, {transform_indices = @transform_1, window_bounds = array<i64: 2, 8>}]} {
    %c0 = arith.constant 0 : index
    %c0_0 = arith.constant 0 : index
    %0 = vector.load %arg1[%c0, %c0_0] : memref<8x256xf32, #tpu.memory_space<vmem>>, vector<8x256xf32>
    %cst = arith.constant dense<0xFF800000> : vector<8xf32>
    %1 = vector.multi_reduction <maximumf>, %0, %cst [1] : vector<8x256xf32> to vector<8xf32>
    %2 = vector.shape_cast %1 : vector<8xf32> to vector<8x1xf32>
    %cst_1 = arith.constant dense<0.000000e+00> : vector<8xf32>
    %3 = vector.multi_reduction <add>, %0, %cst_1 [1] : vector<8x256xf32> to vector<8xf32>
    %4 = vector.shape_cast %3 : vector<8xf32> to vector<8x1xf32>
    %cst_2 = arith.constant 3.906250e-03 : f32
    %5 = vector.broadcast %cst_2 : f32 to vector<8x1xf32>
    %6 = arith.mulf %4, %5 : vector<8x1xf32>
    %7 = tpu.transpose %2, [1, 0] : vector<8x1xf32> -> vector<1x8xf32>
    %8 = tpu.transpose %6, [1, 0] : vector<8x1xf32> -> vector<1x8xf32>
    %9 = tpu.concatenate %7, %8 in 0 : vector<1x8xf32>, vector<1x8xf32> -> vector<2x8xf32>
    %c0_3 = arith.constant 0 : index
    %c0_4 = arith.constant 0 : index
    %10 = vector.load %arg2[%c0_3, %c0_4] : memref<2x8xf32, #tpu.memory_space<vmem>>, vector<2x8xf32>
    tpu.vector_store %arg2[%c0_3, %c0_4], %9 {strides = array<i32>} : memref<2x8xf32, #tpu.memory_space<vmem>>, vector<2x8xf32>,
    return
  }
  func.func @transform_0(%arg0: i32) -> (i32, i32) {
    %c0_i32 = arith.constant 0 : i32
    %c0_i32_0 = arith.constant 0 : i32
    return %arg0, %c0_i32 : i32, i32
  }
  func.func @transform_1(%arg0: i32) -> (i32, i32) {
    %c0_i32 = arith.constant 0 : i32
    %c0_i32_0 = arith.constant 0 : i32
    return %c0_i32, %arg0 : i32, i32
  }
}

</mosaic_0001>

<bundles_post_ra>
// kernel: _adaptive_concat_pool2d.1
= control target key start
LH: loop header
LB: loop body
LE: loop exit
PB: predicated region body
PF: predicated region fallthrough
CT: control target
= control target key end

     0   :  { %vm84_vm0 = vcmask 1040384   ;;  %vm86_vm1 = vcmask 58368   ;;  %s112_s0 = inlined_call_operand.vmem [shape: f32[8,256], index: 0, kind: input, shape index: {}]   ;;  %s113_s1 = inlined_call_operand.vmem [shape: f32[2,8], index: 1, kind: output, shape index: {}]  }
   0x1   :  { %v8_v0 = vld [vmem:[%s112_s0] sm:$0xff]  ;;  %v9_v1 = vld [vmem:[%s112_s0 + $0x8] sm:$0xff] }
   0x2   :  { %v13_v2 = vadd.f32 %v9_v1, %v8_v0  ;;  %v10_v3 = vmax.f32 %v8_v0, %v9_v1 }
   0x4   :  { %14 = vadd.xlane.f32.xlu0 %v13_v2 }
   0x8   :  { %11 = vmax.xlane.f32.xlu0 %v10_v3 }
  0x91   :  { %v15_v4 = vpop.xlane.xlu0 %14 }
  0x92   :  { %v16_v5 = vmul.f32 0.00390625, %v15_v4 }
  0x94   :  { %49 = vxpose.xlu1.b32.start.end [1/1] (short) (narrow) %v16_v5, 8 }
  0x95   :  { %v12_v6 = vpop.xlane.xlu0 %11 }
  0x98   :  { %17 = vxpose.xlu1.b32.start.end [1/1] (short) (narrow) %v12_v6, 8 }
 0x114   :  { %v65_v7 = vpop.trf.xlu1 }
 0x115   :  { %v82_v8 = vrot.slane %v65_v7, 7 }
 0x118   :  { %v33_v9 = vpop.trf.xlu1 }
 0x119   :  { %v85_v10 = vsel %vm84_vm0, %v33_v9, %v82_v8 }
 0x11a   :  { %87 = vst.msk [vmem:[%s113_s1] sm:$0x3] %vm86_vm1, %v85_v10 }

</bundles_post_ra>
